<compile_context>
chip_gen: v6e
topology: v6e:2x2x1
jax: 0.10.0
libtpu: 0.0.40
codegen_flags: <defaults>
</compile_context>

<pallas_src>
import functools
import math

import jax
import jax.numpy as jnp
from jax.experimental import pallas as pl
from jax.experimental.pallas import tpu as pltpu

EPS = 1e-5        # nn.LayerNorm default
NEG_INF = -1e9    # masked_fill value used by the reference implementation


# ------------------------------ Pallas kernels ------------------------------ #

def ln_matmul_kernel(x_ref, g_ref, b_ref, w_ref, wb_ref, o_ref, *, eps):
    """o = LayerNorm(x) @ W + b   (fused pre-LN + QKV projection)."""
    x = x_ref[...].astype(jnp.float32)
    mean = jnp.mean(x, axis=-1, keepdims=True)
    var = jnp.mean(jnp.square(x - mean), axis=-1, keepdims=True)
    xn = (x - mean) * jax.lax.rsqrt(var + eps) * g_ref[...] + b_ref[...]
    y = jnp.dot(xn.astype(x_ref.dtype), w_ref[...],
                preferred_element_type=jnp.float32) + wb_ref[...]
    o_ref[...] = y.astype(o_ref.dtype)


def proj_residual_kernel(a_ref, w_ref, b_ref, r_ref, o_ref):
    """o = residual + a @ W + b   (attention output projection, fused residual)."""
    y = jnp.dot(a_ref[...], w_ref[...], preferred_element_type=jnp.float32) + b_ref[...]
    o_ref[...] = (r_ref[...].astype(jnp.float32) + y).astype(o_ref.dtype)


def ln_ffn_residual_kernel(x_ref, g_ref, b_ref, w1_ref, b1_ref, w2_ref, b2_ref,
                           o_ref, *, eps):
    """o = x + relu(LayerNorm(x) @ W1 + b1) @ W2 + b2  (fused pre-LN FFN sublayer)."""
    x = x_ref[...].astype(jnp.float32)
    mean = jnp.mean(x, axis=-1, keepdims=True)
    var = jnp.mean(jnp.square(x - mean), axis=-1, keepdims=True)
    xn = (x - mean) * jax.lax.rsqrt(var + eps) * g_ref[...] + b_ref[...]
    h = jnp.dot(xn.astype(x_ref.dtype), w1_ref[...],
                preferred_element_type=jnp.float32) + b1_ref[...]
    h = jnp.maximum(h, 0.0)
    y = jnp.dot(h.astype(x_ref.dtype), w2_ref[...],
                preferred_element_type=jnp.float32) + b2_ref[...]
    o_ref[...] = (x + y).astype(o_ref.dtype)


def layernorm_kernel(x_ref, g_ref, b_ref, o_ref, *, eps):
    x = x_ref[...].astype(jnp.float32)
    mean = jnp.mean(x, axis=-1, keepdims=True)
    var = jnp.mean(jnp.square(x - mean), axis=-1, keepdims=True)
    y = (x - mean) * jax.lax.rsqrt(var + eps) * g_ref[...] + b_ref[...]
    o_ref[...] = y.astype(o_ref.dtype)


def attention_kernel(qkv_ref, m_ref, o_ref, *, num_heads, scale):
    """Per-batch multi-head attention on a fused QKV block.

    qkv_ref: (1, S, 3D)  feature dim laid out as [Q | K | V], each D = H*dk
    m_ref:   (1, 1, S)   additive key mask (0 keep / -1e9 masked)
    o_ref:   (1, S, D)   head outputs written back in head order (== concat)
    """
    S = qkv_ref.shape[1]
    D = qkv_ref.shape[2] // 3
    dk = D // num_heads
    qkv = qkv_ref[0]                        # (S, 3D)
    m = m_ref[0].astype(jnp.float32)        # (1, S), broadcast over query rows

    # TODO(synk): for long sequences replace this full-score path with a
    # flash-style kv-tiled loop (online softmax) so the (S, S) scores never
    # exceed VMEM.
    for h in range(num_heads):              # static unroll; heads are few
        lo = h * dk
        qh = qkv[:, lo:lo + dk]                       # (S, dk)
        kh = qkv[:, D + lo:D + lo + dk]               # (S, dk)
        vh = qkv[:, 2 * D + lo:2 * D + lo + dk]       # (S, dk)
        s = jax.lax.dot_general(qh, kh, (((1,), (1,)), ((), ())),
                                preferred_element_type=jnp.float32) * scale
        s = s + m
        s = s - jnp.max(s, axis=-1, keepdims=True)
        p = jnp.exp(s)
        # approx=False keeps results bit-close to the f32 reference; flip to
        # approx=True in production to move the divide onto the EUP slot.
        p = p * pl.reciprocal(jnp.sum(p, axis=-1, keepdims=True), approx=False)
        oh = jnp.dot(p.astype(vh.dtype), vh, preferred_element_type=jnp.float32)
        o_ref[0, :, lo:lo + dk] = oh.astype(o_ref.dtype)


# ----------------------------- kernel wrappers ------------------------------ #

_PARALLEL_1D = pltpu.CompilerParams(dimension_semantics=("parallel",))


def _row_tile(M, max_tile=256):
    # TODO(synk): sweep 512-1024 rows on v6e/v5e (128 MiB VMEM); keep <=256 on
    # v7x (64 MiB) and set vmem_limit_bytes explicitly for production shapes.
    return M if M <= max_tile else max_tile


def pallas_ln_matmul(x2d, g, b, w, wb):
    M, D = x2d.shape
    Dout = w.shape[1]
    tm = _row_tile(M)
    return pl.pallas_call(
        functools.partial(ln_matmul_kernel, eps=EPS),
        out_shape=jax.ShapeDtypeStruct((M, Dout), x2d.dtype),
        grid=(pl.cdiv(M, tm),),
        in_specs=[pl.BlockSpec((tm, D), lambda i: (i, 0)),
                  pl.BlockSpec((1, D), lambda i: (0, 0)),
                  pl.BlockSpec((1, D), lambda i: (0, 0)),
                  pl.BlockSpec((D, Dout), lambda i: (0, 0)),
                  pl.BlockSpec((1, Dout), lambda i: (0, 0))],
        out_specs=pl.BlockSpec((tm, Dout), lambda i: (i, 0)),
        compiler_params=_PARALLEL_1D,
    )(x2d, g.reshape(1, D), b.reshape(1, D), w, wb)


def pallas_proj_residual(a2d, w, b, resid2d):
    M, Din = a2d.shape
    Dout = w.shape[1]
    tm = _row_tile(M)
    return pl.pallas_call(
        proj_residual_kernel,
        out_shape=jax.ShapeDtypeStruct((M, Dout), resid2d.dtype),
        grid=(pl.cdiv(M, tm),),
        in_specs=[pl.BlockSpec((tm, Din), lambda i: (i, 0)),
                  pl.BlockSpec((Din, Dout), lambda i: (0, 0)),
                  pl.BlockSpec((1, Dout), lambda i: (0, 0)),
                  pl.BlockSpec((tm, Dout), lambda i: (i, 0))],
        out_specs=pl.BlockSpec((tm, Dout), lambda i: (i, 0)),
        compiler_params=_PARALLEL_1D,
    )(a2d, w, b, resid2d)


def pallas_ln_ffn_residual(x2d, g, b, w1, b1, w2, b2):
    M, D = x2d.shape
    F = w1.shape[1]
    tm = _row_tile(M)
    return pl.pallas_call(
        functools.partial(ln_ffn_residual_kernel, eps=EPS),
        out_shape=jax.ShapeDtypeStruct((M, D), x2d.dtype),
        grid=(pl.cdiv(M, tm),),
        in_specs=[pl.BlockSpec((tm, D), lambda i: (i, 0)),
                  pl.BlockSpec((1, D), lambda i: (0, 0)),
                  pl.BlockSpec((1, D), lambda i: (0, 0)),
                  pl.BlockSpec((D, F), lambda i: (0, 0)),
                  pl.BlockSpec((1, F), lambda i: (0, 0)),
                  pl.BlockSpec((F, D), lambda i: (0, 0)),
                  pl.BlockSpec((1, D), lambda i: (0, 0))],
        out_specs=pl.BlockSpec((tm, D), lambda i: (i, 0)),
        compiler_params=_PARALLEL_1D,
    )(x2d, g.reshape(1, D), b.reshape(1, D), w1, b1, w2, b2)


def pallas_layer_norm(x2d, g, b):
    M, D = x2d.shape
    tm = _row_tile(M)
    return pl.pallas_call(
        functools.partial(layernorm_kernel, eps=EPS),
        out_shape=jax.ShapeDtypeStruct((M, D), x2d.dtype),
        grid=(pl.cdiv(M, tm),),
        in_specs=[pl.BlockSpec((tm, D), lambda i: (i, 0)),
                  pl.BlockSpec((1, D), lambda i: (0, 0)),
                  pl.BlockSpec((1, D), lambda i: (0, 0))],
        out_specs=pl.BlockSpec((tm, D), lambda i: (i, 0)),
        compiler_params=_PARALLEL_1D,
    )(x2d, g.reshape(1, D), b.reshape(1, D))


def pallas_attention(qkv, addmask, num_heads):
    # qkv: (B, S, 3D); addmask: (B, 1, S) additive; out: (B, S, D)
    B, S, D3 = qkv.shape
    D = D3 // 3
    dk = D // num_heads
    return pl.pallas_call(
        functools.partial(attention_kernel, num_heads=num_heads,
                          scale=1.0 / math.sqrt(dk)),
        out_shape=jax.ShapeDtypeStruct((B, S, D), qkv.dtype),
        grid=(B,),
        in_specs=[pl.BlockSpec((1, S, D3), lambda i: (i, 0, 0)),
                  pl.BlockSpec((1, 1, S), lambda i: (i, 0, 0))],
        out_specs=pl.BlockSpec((1, S, D), lambda i: (i, 0, 0)),
        compiler_params=_PARALLEL_1D,
    )(qkv, addmask)


# ------------------------- transformer built on kernels --------------------- #

def attention_sublayer(x, addmask, lp):
    """x + Wo @ MHA(LayerNorm(x)) with fused QKV; returns (B*S, D)."""
    B, S, D = x.shape
    x2 = x.reshape(B * S, D)                       # contiguous view, no copy
    ap = lp['attn']
    qkv = pallas_ln_matmul(x2, lp['ln1_g'], lp['ln1_b'], ap['wqkv'], ap['bqkv'])
    attn = pallas_attention(qkv.reshape(B, S, 3 * D), addmask, ap['num_heads'])
    return pallas_proj_residual(attn.reshape(B * S, D), ap['wo'], ap['bo'], x2)


def encoder_layer(x, addmask, lp, target_domain):
    B, S, D = x.shape
    x2 = attention_sublayer(x, addmask, lp)        # residual already added
    x2 = pallas_ln_ffn_residual(x2, lp['ln2_g'], lp['ln2_b'],
                                lp['ff_w1'], lp['ff_b1'], lp['ff_w2'], lp['ff_b2'])
    if target_domain is not None:
        a = lp['adapters'][target_domain]
        x2 = pallas_ln_ffn_residual(x2, a['ln_g'], a['ln_b'],
                                    a['w1'], a['b1'], a['w2'], a['b2'])
    return x2.reshape(B, S, D)


def transformer_encoder(x, src_mask, params, target_domain=None):
    # additive key mask computed once: 0 = keep, -1e9 = masked
    addmask = ((1.0 - src_mask) * NEG_INF).astype(jnp.float32)
    layers_adapter_output = []
    for lp in params['layers']:
        x = encoder_layer(x, addmask, lp, target_domain)
        layers_adapter_output.append(x)
    B, S, D = x.shape
    memory = pallas_layer_norm(
        x.reshape(B * S, D), params['final_ln_g'], params['final_ln_b']).reshape(B, S, D)
    return {'memory': memory, 'adapter_output': layers_adapter_output}


# ----------------------------- pure-JAX reference --------------------------- #

def _ref_ln(x, g, b, eps=EPS):
    m = jnp.mean(x, -1, keepdims=True)
    v = jnp.mean((x - m) ** 2, -1, keepdims=True)
    return (x - m) / jnp.sqrt(v + eps) * g + b


def _ref_mha(x, mask, ap):
    B, S, D = x.shape
    H = ap['num_heads']
    dk = D // H
    qkv = x @ ap['wqkv'] + ap['bqkv']
    q, k, v = jnp.split(qkv, 3, axis=-1)
    q = q.reshape(B, S, H, dk).transpose(0, 2, 1, 3)
    k = k.reshape(B, S, H, dk).transpose(0, 2, 1, 3)
    v = v.reshape(B, S, H, dk).transpose(0, 2, 1, 3)
    s = jnp.einsum('bhqd,bhkd->bhqk', q, k) / math.sqrt(dk)
    s = jnp.where(mask[:, :, None, :] == 0, -1e9, s)
    p = jax.nn.softmax(s, axis=-1)
    o = jnp.einsum('bhqk,bhkd->bhqd', p, v).transpose(0, 2, 1, 3).reshape(B, S, D)
    return o @ ap['wo'] + ap['bo']


def _ref_ffn(x, w1, b1, w2, b2):
    return jnp.maximum(x @ w1 + b1, 0.0) @ w2 + b2


def _ref_encoder(x, mask, params, target_domain=None):
    outs = []
    for lp in params['layers']:
        x = x + _ref_mha(_ref_ln(x, lp['ln1_g'], lp['ln1_b']), mask, lp['attn'])
        x = x + _ref_ffn(_ref_ln(x, lp['ln2_g'], lp['ln2_b']),
                         lp['ff_w1'], lp['ff_b1'], lp['ff_w2'], lp['ff_b2'])
        if target_domain is not None:
            a = lp['adapters'][target_domain]
            x = x + _ref_ffn(_ref_ln(x, a['ln_g'], a['ln_b']),
                             a['w1'], a['b1'], a['w2'], a['b2'])
        outs.append(x)
    return {'memory': _ref_ln(x, params['final_ln_g'], params['final_ln_b']),
            'adapter_output': outs}


# --------------------------------- parameters ------------------------------- #

def init_params(key, D, H, FF, num_layers, adapter_dict, adapter_bottleneck):
    keys = iter(jax.random.split(key, 64))

    def lin(din, dout):
        kw, kb = jax.random.split(next(keys))
        return (jax.random.normal(kw, (din, dout), jnp.float32) * 0.05,
                jax.random.normal(kb, (1, dout), jnp.float32) * 0.05)

    attn = {'num_heads': H}
    attn['wqkv'], attn['bqkv'] = lin(D, 3 * D)     # fused [Q | K | V] projection
    attn['wo'], attn['bo'] = lin(D, D)

    layer = {
        'attn': attn,
        'ln1_g': jnp.ones((D,), jnp.float32), 'ln1_b': jnp.zeros((D,), jnp.float32),
        'ln2_g': jnp.ones((D,), jnp.float32), 'ln2_b': jnp.zeros((D,), jnp.float32),
    }
    layer['ff_w1'], layer['ff_b1'] = lin(D, FF)
    layer['ff_w2'], layer['ff_b2'] = lin(FF, D)

    adapters = {}
    for domain, size in zip(adapter_dict, adapter_bottleneck):
        a = {'ln_g': jnp.ones((D,), jnp.float32), 'ln_b': jnp.zeros((D,), jnp.float32)}
        a['w1'], a['b1'] = lin(D, size)
        a['w2'], a['b2'] = lin(size, D)
        adapters[domain] = a
    layer['adapters'] = adapters

    # clones() deep-copies -> every layer starts with identical parameters.
    return {
        'layers': [layer] * num_layers,
        'final_ln_g': jnp.ones((D,), jnp.float32),
        'final_ln_b': jnp.zeros((D,), jnp.float32),
    }


# ------------------------------------ main ---------------------------------- #

if __name__ == "__main__":
    B, S, D, H, FF = 2, 8, 32, 4, 64
    num_layers = 2
    adapter_dict = ["medical", "law"]
    adapter_bottleneck = [16, 24]
    target_domain = "medical"

    key = jax.random.PRNGKey(0)
    k_x, k_p = jax.random.split(key)
    x = jax.random.normal(k_x, (B, S, D), jnp.float32)
    # src_mask: (B, 1, S); 1 = keep, 0 = masked key position
    src_mask = jnp.ones((B, 1, S), jnp.float32)
    src_mask = src_mask.at[1, 0, S - 2:].set(0.0)

    params = init_params(k_p, D, H, FF, num_layers, adapter_dict, adapter_bottleneck)

    out = transformer_encoder(x, src_mask, params, target_domain=target_domain)
    jax.block_until_ready(out['memory'])
    jax.block_until_ready(out['adapter_output'][-1])

    ref = _ref_encoder(x, src_mask, params, target_domain=target_domain)

    assert out['memory'].shape == (B, S, D)
    assert len(out['adapter_output']) == num_layers
    assert jnp.allclose(out['memory'], ref['memory'], atol=1e-4, rtol=1e-4)
    for got, want in zip(out['adapter_output'], ref['adapter_output']):
        assert jnp.allclose(got, want, atol=1e-4, rtol=1e-4)

    print("KERNEL_OK")
</pallas_src>

<mosaic_0001>
module attributes {stable_mosaic.version = 11 : i64} {
  func.func @ln_matmul_kernel(%arg0: i32, %arg1: memref<16x32xf32, #tpu.memory_space<vmem>>, %arg2: memref<1x32xf32, #tpu.memory_space<vmem>>, %arg3: memref<1x32xf32, #tpu.memory_space<vmem>>, %arg4: memref<32x96xf32, #tpu.memory_space<vmem>>, %arg5: memref<1x96xf32, #tpu.memory_space<vmem>>, %arg6: memref<16x96xf32, #tpu.memory_space<vmem>>) attributes {dimension_semantics = [#tpu.dimension_semantics<parallel>], iteration_bounds = array<i64: 1>, scalar_prefetch = 0 : i64, scratch_operands = 0 : i64, tpu.core_type = #tpu.core_type<tc>, window_params = [{transform_indices = @transform_0, window_bounds = array<i64: 16, 32>}, {pipeline_mode = #tpu.pipeline_mode<synchronous>, transform_indices = @transform_1, window_bounds = array<i64: 1, 32>}, {pipeline_mode = #tpu.pipeline_mode<synchronous>, transform_indices = @transform_2, window_bounds = array<i64: 1, 32>}, {pipeline_mode = #tpu.pipeline_mode<synchronous>, transform_indices = @transform_3, window_bounds = array<i64: 32, 96>}, {pipeline_mode = #tpu.pipeline_mode<synchronous>, transform_indices = @transform_4, window_bounds = array<i64: 1, 96>}, {transform_indices = @transform_5, window_bounds = array<i64: 16, 96>}]} {
    %c0 = arith.constant 0 : index
    %c0_0 = arith.constant 0 : index
    %0 = vector.load %arg1[%c0, %c0_0] : memref<16x32xf32, #tpu.memory_space<vmem>>, vector<16x32xf32>
    %cst = arith.constant dense<0.000000e+00> : vector<16xf32>
    %1 = vector.multi_reduction <add>, %0, %cst [1] : vector<16x32xf32> to vector<16xf32>
    %2 = vector.shape_cast %1 : vector<16xf32> to vector<16x1xf32>
    %cst_1 = arith.constant 3.200000e+01 : f32
    %3 = vector.broadcast %cst_1 : f32 to vector<16x1xf32>
    %4 = arith.divf %2, %3 : vector<16x1xf32>
    %5 = vector.broadcast %4 : vector<16x1xf32> to vector<16x32xf32>
    %6 = arith.subf %0, %5 : vector<16x32xf32>
    %7 = arith.mulf %6, %6 : vector<16x32xf32>
    %cst_2 = arith.constant dense<0.000000e+00> : vector<16xf32>
    %8 = vector.multi_reduction <add>, %7, %cst_2 [1] : vector<16x32xf32> to vector<16xf32>
    %9 = vector.shape_cast %8 : vector<16xf32> to vector<16x1xf32>
    %cst_3 = arith.constant 3.200000e+01 : f32
    %10 = vector.broadcast %cst_3 : f32 to vector<16x1xf32>
    %11 = arith.divf %9, %10 : vector<16x1xf32>
    %12 = vector.broadcast %4 : vector<16x1xf32> to vector<16x32xf32>
    %13 = arith.subf %0, %12 : vector<16x32xf32>
    %cst_4 = arith.constant 9.99999974E-6 : f32
    %14 = vector.broadcast %cst_4 : f32 to vector<16x1xf32>
    %15 = arith.addf %11, %14 : vector<16x1xf32>
    %16 = math.rsqrt %15 : vector<16x1xf32>
    %17 = vector.broadcast %16 : vector<16x1xf32> to vector<16x32xf32>
    %18 = arith.mulf %13, %17 : vector<16x32xf32>
    %c0_5 = arith.constant 0 : index
    %c0_6 = arith.constant 0 : index
    %19 = vector.load %arg2[%c0_5, %c0_6] : memref<1x32xf32, #tpu.memory_space<vmem>>, vector<1x32xf32>
    %20 = vector.broadcast %19 : vector<1x32xf32> to vector<16x32xf32>
    %21 = arith.mulf %18, %20 : vector<16x32xf32>
    %c0_7 = arith.constant 0 : index
    %c0_8 = arith.constant 0 : index
    %22 = vector.load %arg3[%c0_7, %c0_8] : memref<1x32xf32, #tpu.memory_space<vmem>>, vector<1x32xf32>
    %23 = vector.broadcast %22 : vector<1x32xf32> to vector<16x32xf32>
    %24 = arith.addf %21, %23 : vector<16x32xf32>
    %c0_9 = arith.constant 0 : index
    %c0_10 = arith.constant 0 : index
    %25 = vector.load %arg4[%c0_9, %c0_10] : memref<32x96xf32, #tpu.memory_space<vmem>>, vector<32x96xf32>
    %cst_11 = arith.constant dense<0.000000e+00> : vector<16x96xf32>
    %26 = tpu.matmul %24, %25, %cst_11 {dimension_numbers = #tpu.dot_dimension_numbers<[1], [0], [0], [1], [0, 0, 1, 1], [], []>} : vector<16x32xf32>, vector<32x96xf32>, vector<16x96xf32> -> vector<16x96xf32>
    %c0_12 = arith.constant 0 : index
    %c0_13 = arith.constant 0 : index
    %27 = vector.load %arg5[%c0_12, %c0_13] : memref<1x96xf32, #tpu.memory_space<vmem>>, vector<1x96xf32>
    %28 = vector.broadcast %27 : vector<1x96xf32> to vector<16x96xf32>
    %29 = arith.addf %26, %28 : vector<16x96xf32>
    %c0_14 = arith.constant 0 : index
    %c0_15 = arith.constant 0 : index
    %30 = vector.load %arg6[%c0_14, %c0_15] : memref<16x96xf32, #tpu.memory_space<vmem>>, vector<16x96xf32>
    tpu.vector_store %arg6[%c0_14, %c0_15], %29 {strides = array<i32>} : memref<16x96xf32, #tpu.memory_space<vmem>>, vector<16x96xf32>,
    return
  }
  func.func @transform_0(%arg0: i32) -> (i32, i32) {
    %c0_i32 = arith.constant 0 : i32
    %c0_i32_0 = arith.constant 0 : i32
    return %arg0, %c0_i32 : i32, i32
  }
  func.func @transform_1(%arg0: i32) -> (i32, i32) {
    %c0_i32 = arith.constant 0 : i32
    %c0_i32_0 = arith.constant 0 : i32
    %c0_i32_1 = arith.constant 0 : i32
    return %c0_i32, %c0_i32_0 : i32, i32
  }
  func.func @transform_2(%arg0: i32) -> (i32, i32) {
    %c0_i32 = arith.constant 0 : i32
    %c0_i32_0 = arith.constant 0 : i32
    %c0_i32_1 = arith.constant 0 : i32
    return %c0_i32, %c0_i32_0 : i32, i32
  }
  func.func @transform_3(%arg0: i32) -> (i32, i32) {
    %c0_i32 = arith.constant 0 : i32
    %c0_i32_0 = arith.constant 0 : i32
    %c0_i32_1 = arith.constant 0 : i32
    return %c0_i32, %c0_i32_0 : i32, i32
  }
  func.func @transform_4(%arg0: i32) -> (i32, i32) {
    %c0_i32 = arith.constant 0 : i32
    %c0_i32_0 = arith.constant 0 : i32
    %c0_i32_1 = arith.constant 0 : i32
    return %c0_i32, %c0_i32_0 : i32, i32
  }
  func.func @transform_5(%arg0: i32) -> (i32, i32) {
    %c0_i32 = arith.constant 0 : i32
    %c0_i32_0 = arith.constant 0 : i32
    return %arg0, %c0_i32 : i32, i32
  }
}

</mosaic_0001>

<bundles_post_ra>
// kernel: tpu_custom_call.1
= control target key start
LH: loop header
LB: loop body
LE: loop exit
PB: predicated region body
PF: predicated region fallthrough
CT: control target
= control target key end

     0   :  { %10 = vsyncpa [#allocation3], 0  ;;  %s375_s0 = inlined_call_operand.hbm [shape: f32[16,32], index: 0, kind: input, shape index: {}]   ;;  %s376_s1 = inlined_call_operand.vmem [shape: f32[1,32], index: 1, kind: input, shape index: {}]   ;;  %s377_s2 = inlined_call_operand.vmem [shape: f32[1,32], index: 2, kind: input, shape index: {}]   ;;  %s378_s3 = inlined_call_operand.hbm [shape: f32[32,96], index: 3, kind: input, shape index: {}]   ;;  %s379_s4 = inlined_call_operand.vmem [shape: f32[1,96], index: 4, kind: input, shape index: {}]   ;;  %s380_s5 = inlined_call_operand.hbm [shape: f32[16,96], index: 5, kind: output, shape index: {}]  }
   0x1   :  { %11 = vsyncpa [#allocation6], 0 }
   0x2   :  { %12 = vsyncpa [#allocation4], 0  ;;  %s307_s18 = smov [#allocation2]  }
   0x3   :  { %s18_s19 = sshll.u32 %s307_s18, 4  ;;  %s19_s19 = int_to_ptr.vmem [resolvable:$true] %s18_s19 }
   0x4   :  { %s249_s20 = scalar_lea.vmem %s19_s19, 256  ;;  %p254_p1 = scmp.lt.s32.totalorder %s19_s19, %s19_s19 }
   0x5   :  { %p250_p0 = scmp.ne.s32.totalorder %s19_s19, %s249_s20  ;;  %p255_p2 = scmp.lt.s32.totalorder %s249_s20, %s249_s20 }
   0x7   :  { %p256_p3 = por %p255_p2, %p254_p1 }
   0x9   :  { %p257_p4 = pnand %p256_p3, %p250_p0 }
   0xb   :  { %260 = shalt.err (!%p257_p4)
}
   0xc   :  { %s308_s21 = smov 128   ;;  %s309_s22 = smov 8  }
   0xd   :  { %24 = dma.hbm_to_vmem [thread:$0]  %s375_s0, 256, %s19_s19, [#allocation3], %s308_s21, %s308_s21, %s309_s22  }
   0xe   :  { %s310_s25 = smov [#allocation5]  }
   0xf   :  { %s34_s26 = sshll.u32 %s310_s25, 4  ;;  %s35_s26 = int_to_ptr.vmem [resolvable:$true] %s34_s26 }
  0x10   :  { %s269_s27 = scalar_lea.vmem %s35_s26, 512  ;;  %p274_p6 = scmp.lt.s32.totalorder %s35_s26, %s35_s26 }
  0x11   :  { %p270_p5 = scmp.ne.s32.totalorder %s35_s26, %s269_s27  ;;  %p275_p7 = scmp.lt.s32.totalorder %s269_s27, %s269_s27 }
  0x13   :  { %p276_p8 = por %p275_p7, %p274_p6 }
  0x15   :  { %p277_p9 = pnand %p276_p8, %p270_p5 }
  0x17   :  { %280 = shalt.err (!%p277_p9)
}
  0x18   :  { %40 = dma.hbm_to_vmem [thread:$0]  %s378_s3, 512, %s35_s26, [#allocation6], %s308_s21, %s308_s21, %s309_s22  }
  0x19   :  { %301 = dma.done.wait [#allocation3], 256  }
  0x1a   :  { %302 = vsyncadd [#allocation3], 4294967040 }
  0x1b   :  { %303 = dma.done.wait [#allocation6], 512  }
  0x1c   :  { %304 = vsyncadd [#allocation6], 4294966784  ;;  %vm51_vm0 = vcmask 261120   ;;  %v49_v0 = vld [vmem:[#allocation2] sm:$0xff]  ;;  %v50_v1 = vld [vmem:[#allocation2 + $0x8] sm:$0xff]  ;;  %vm189_vm1 = vcmask 785408  }
  0x1d   :  { %v52_v2 = vsel %vm51_vm0, %v49_v0, 0.0  ;;  %v55_v3 = vsel %vm51_vm0, %v50_v1, 0.0  ;;  %v100_v14 = vld [vmem:[#allocation5 + $0x18] sm:$0xff]  ;;  %v99_v15 = vld [vmem:[#allocation5 + $0x10] sm:$0xff]  ;;  %v98_v16 = vld [vmem:[#allocation5 + $0x8] sm:$0xff] }
  0x1e   :  { %53 = vadd.xlane.f32.xlu0 %v52_v2  ;;  %221 = vmatprep.subr.mxu0 %v100_v14  ;;  %v97_v17 = vld [vmem:[#allocation5] sm:$0xff]  ;;  %v210_v25 = vld [vmem:[%s376_s1] ss:$0 sm:$0xff]  ;;  %s311_s1 = smov [#allocation7]  }
  0x1f   :  { %222 = vmatpush3.msra.mxu0 %v100_v14  ;;  %v211_v27 = vld [vmem:[%s377_s2] ss:$0 sm:$0xff]  ;;  %s197_s9 = sshll.u32 %s311_s1, 4  ;;  %s198_s9 = int_to_ptr.vmem [resolvable:$true] %s197_s9 }
  0x20   :  { %223 = vmatprep.subr.mxu0 %v99_v15  ;;  %v212_v34 = vld [vmem:[%s379_s4] ss:$0 sm:$0xff]  ;;  %s281_s2 = scalar_lea.vmem %s198_s9, 256  ;;  %p286_p11 = scmp.lt.s32.totalorder %s198_s9, %s198_s9 }
  0x21   :  { %224 = vmatpush3.msra.mxu0 %v99_v15  ;;  %p282_p10 = scmp.ne.s32.totalorder %s198_s9, %s281_s2  ;;  %p287_p12 = scmp.lt.s32.totalorder %s281_s2, %s281_s2 }
  0x22   :  { %56 = vadd.xlane.f32.xlu0 %v55_v3  ;;  %225 = vmatprep.subr.mxu0 %v98_v16 }
  0x23   :  { %226 = vmatpush3.msra.mxu0 %v98_v16  ;;  %p288_p13 = por %p287_p12, %p286_p11 }
  0x24   :  { %227 = vmatprep.subr.mxu0 %v97_v17 }
  0x25   :  { %228 = vmatpush3.msra.mxu0 %v97_v17  ;;  %p289_p0 = pnand %p288_p13, %p282_p10 }
  0xa7   :  { %v54_v4 = vpop.xlane.xlu0 %53 }
  0xa8   :  { %v59_v5 = vmul.f32 0.03125, %v54_v4 }
  0xaa   :  { %v61_v6 = vsub.f32 %v49_v0, %v59_v5 }
  0xab   :  { %v57_v7 = vpop.xlane.xlu0 %56 }
  0xac   :  { %v60_v8 = vmul.f32 0.03125, %v57_v7  ;;  %v63_v9 = vmul.f32 %v61_v6, %v61_v6 }
  0xae   :  { %v62_v10 = vsub.f32 %v50_v1, %v60_v8  ;;  %v65_v11 = vsel %vm51_vm0, %v63_v9, 0.0 }
  0xaf   :  { %66 = vadd.xlane.f32.xlu1 %v65_v11 }
  0xb0   :  { %v64_v12 = vmul.f32 %v62_v10, %v62_v10 }
  0xb2   :  { %v68_v13 = vsel %vm51_vm0, %v64_v12, 0.0 }
  0xb3   :  { %69 = vadd.xlane.f32.xlu1 %v68_v13 }
 0x138   :  { %v67_v18 = vpop.xlane.xlu1 %66 }
 0x139   :  { %v71_v19 = vmul.f32 0.03125, %v67_v18 }
 0x13b   :  { %v73_v20 = vadd.f32 1e-05, %v71_v19 }
 0x13c   :  { %v70_v21 = vpop.xlane.xlu1 %69 }
 0x13d   :  { %237 = vrsqrt.f32 %v73_v20  ;;  %v72_v22 = vmul.f32 0.03125, %v70_v21 }
 0x13f   :  { %v74_v23 = vadd.f32 1e-05, %v72_v22 }
 0x141   :  { %239 = vrsqrt.f32 %v74_v23 }
 0x14a   :  { %v238_v24 = vpop.eup %237 }
 0x14b   :  { %v77_v26 = vmul.f32 %v238_v24, %v61_v6 }
 0x14d   :  { %v86_v28 = vmul.f32 %v210_v25, %v77_v26 }
 0x14e   :  { %v240_v29 = vpop.eup %239 }
 0x14f   :  { %v78_v30 = vmul.f32 %v240_v29, %v62_v10  ;;  %v95_v31 = vadd.f32 %v211_v27, %v86_v28 }
 0x151   :  { %v87_v32 = vmul.f32 %v210_v25, %v78_v30  ;;  %229 = vmatprep.mubr.msk.f32.mxu0 %vm51_vm0, %v95_v31 }
 0x153   :  { %v96_v33 = vadd.f32 %v211_v27, %v87_v32 }
 0x155   :  { %230 = vmatmul.mubr.msk.f32.vlgmr.msra.gmra.mxu0 %vm51_vm0, %v96_v33 }
 0x215   :  { %v231_v35 = vpop.f32.mrf.mxu0 }
 0x216   :  { %v186_v36 = vadd.f32 %v231_v35, %v212_v34 }
 0x217   :  { %v180_v37 = vpop.f32.mrf.mxu0 }
 0x218   :  { %v181_v38 = vadd.f32 %v212_v34, %v180_v37  ;;  %191 = vst.msk [vmem:[#allocation7 + $0x8] sm:$0xff] %vm189_vm1, %v186_v36 }
 0x21a   :  { %190 = vst.msk [vmem:[#allocation7] sm:$0xff] %vm189_vm1, %v181_v38 }
 0x21b   :  { %292 = shalt.err (!%p289_p0)
}
 0x21c   :  { %203 = dma.vmem_to_hbm [thread:$0]  %s198_s9, 256, %s380_s5, [#allocation4], %s308_s21, %s308_s21, %s309_s22  }
 0x21d   :  { %305 = dma.done.wait [#allocation4], 256  }
 0x21e   :  { %306 = vsyncadd [#allocation4], 4294967040 }
 0x21f   :  { %207 = vsyncpa [#allocation3], 1 }
 0x220   :  { %208 = vsyncpa [#allocation6], 1 }
 0x221   :  { %209 = vsyncpa [#allocation4], 1 }

</bundles_post_ra>
